<compile_context>
chip_gen: v6e
topology: v6e:2x2x1
jax: 0.10.0
libtpu: 0.0.40
codegen_flags: <defaults>
</compile_context>

<pallas_src>
import functools

import jax
import jax.numpy as jnp
import numpy as np
from jax.experimental import pallas as pl
from jax.experimental.pallas import tpu as pltpu

NUM_CAT = 5          # plane, modality, binary, organ, abnormality
SMOOTHING = 0.1
CONFIDENCE = 1.0 - SMOOTHING

_LANE = 128
_SUBLANE = 8


def _label_smooth_ce_kernel(x_ref, tgt_ref, cat_ref, catvec_ref, out_ref, *,
                            confidence):
    """One batch tile: soft targets via one-hot MXU matmul, log-softmax CE,
    per-row losses written to a (TB, 1) output block."""
    x = x_ref[...].astype(jnp.float32)                      # (TB, C) logits
    tgt = tgt_ref[...]                                      # (TB, 1) int32
    cat = cat_ref[...]                                      # (TB, 1) int32
    tb, c = x.shape
    ncat = catvec_ref.shape[0]                              # 8 (zero-padded)

    # --- logsumexp over classes (f32 for stability) -------------------------
    m = jnp.max(x, axis=1, keepdims=True)                   # (TB, 1)
    lse = jnp.log(jnp.sum(jnp.exp(x - m), axis=1, keepdims=True)) + m

    # --- soft targets: one_hot(category) @ category_vectors on the MXU ------
    cat_iota = jax.lax.broadcasted_iota(jnp.int32, (tb, ncat), 1)
    one_hot = (cat == cat_iota).astype(jnp.float32)         # (TB, 8)
    soft = jnp.dot(one_hot, catvec_ref[...],
                   preferred_element_type=jnp.float32,
                   precision=jax.lax.Precision.HIGHEST)     # (TB, C)

    # overwrite the target class with the confidence value (xi[idx] = confidence)
    col = jax.lax.broadcasted_iota(jnp.int32, (tb, c), 1)
    soft = jnp.where(col == tgt, confidence, soft)

    # per-row CE: sum_c soft * (lse - x) == sum_c -soft * log_softmax(x)
    out_ref[...] = jnp.sum(soft * (lse - x), axis=1, keepdims=True)


def _round_up(v, m):
    return ((v + m - 1) // m) * m


def _vmem_limit_bytes():
    """Generation-aware scoped-VMEM limit with headroom."""
    cap = None
    try:
        cap = getattr(pltpu.get_tpu_info(), "vmem_capacity_bytes", None)
    except Exception:
        cap = None
    if not cap:
        cap = 64 * 1024 * 1024          # conservative default (v7x per-TC VMEM)
    # v7x (64 MiB/TC) -> 48 MiB; v5e/v6e (128 MiB) -> capped at 64 MiB
    return int(min(64 * 1024 * 1024, cap * 3 // 4))


def _choose_tile_b(b, c, itemsize, budget_bytes):
    """Pick a batch-tile size: big blocks (amortize per-step overhead) but
    bounded by the VMEM budget and split into >=2 tiles when possible."""
    # double-buffered logits tile + ~5 live (TB, C) f32 intermediates
    bytes_per_row = 2 * c * itemsize + 5 * c * 4
    tb = budget_bytes // bytes_per_row
    tb = max(_SUBLANE, min(4096, (tb // _SUBLANE) * _SUBLANE))
    # keep >= 2 grid steps when the batch allows it so v7x's two TensorCores
    # both get work on the "parallel" grid axis (harmless on v5e/v6e)
    if b > _SUBLANE:
        tb = min(tb, _round_up(-(-b // 2), _SUBLANE))
    return min(tb, _round_up(b, _SUBLANE))


def label_smooth_by_category_loss(x, target, category, category_vectors,
                                  *, smoothing=SMOOTHING, tile_b=None):
    """x: (B, C) f32/bf16 logits; target, category: (B,) int; category_vectors:
    (NUM_CAT, C) f32 smoothing vectors. Returns scalar training-branch loss."""
    b, c = x.shape
    num_cat = category_vectors.shape[0]
    confidence = 1.0 - smoothing

    vmem_limit = _vmem_limit_bytes()
    if tile_b is None:
        tile_b = _choose_tile_b(b, c, jnp.dtype(x.dtype).itemsize,
                                vmem_limit // 2)
    else:
        tile_b = max(_SUBLANE, _round_up(tile_b, _SUBLANE))
    tile_b = min(tile_b, _round_up(b, _SUBLANE))
    num_tiles = -(-b // tile_b)

    # tiny side inputs (no padding of the logits themselves)
    tgt_col = target.astype(jnp.int32).reshape(b, 1)
    cat_col = category.astype(jnp.int32).reshape(b, 1)
    ncat_pad = _round_up(num_cat, _SUBLANE)          # 8 rows for the one-hot matmul
    catvec = jnp.zeros((ncat_pad, c), jnp.float32).at[:num_cat, :].set(
        category_vectors.astype(jnp.float32))

    kernel = functools.partial(_label_smooth_ce_kernel, confidence=confidence)

    # NOTE: the category_vectors block is grid-invariant; pl.Buffered(1) would
    # save one VMEM buffer on v7x but is skipped here for portability.
    per_row = pl.pallas_call(
        kernel,
        out_shape=jax.ShapeDtypeStruct((b, 1), jnp.float32),
        grid=(num_tiles,),
        in_specs=[
            pl.BlockSpec((tile_b, c), lambda i: (i, 0)),        # logits tile
            pl.BlockSpec((tile_b, 1), lambda i: (i, 0)),        # targets
            pl.BlockSpec((tile_b, 1), lambda i: (i, 0)),        # categories
            pl.BlockSpec((ncat_pad, c), lambda i: (0, 0)),      # resident vecs
        ],
        out_specs=pl.BlockSpec((tile_b, 1), lambda i: (i, 0)),
        compiler_params=pltpu.CompilerParams(
            dimension_semantics=("parallel",),
            vmem_limit_bytes=vmem_limit,
        ),
    )(x, tgt_col, cat_col, catvec)

    # mean over the true batch: the output has exactly B rows, and rows of the
    # last partial block that fall outside B are never committed to it.
    return jnp.sum(per_row) / b


def _reference_loss(x, target, category, category_vectors, smoothing=SMOOTHING):
    """Pure-JAX reference matching the PyTorch training-branch semantics."""
    b = x.shape[0]
    confidence = 1.0 - smoothing
    soft = category_vectors[category]                        # (B, C)
    soft = soft.at[jnp.arange(b), target].set(confidence)    # xi[idx] = confidence
    logsm = jax.nn.log_softmax(x.astype(jnp.float32), axis=1)
    return jnp.mean(jnp.sum(-soft * logsm, axis=1))


def _make_category_vectors(key, num_classes):
    """Deterministic synthetic stand-in for computeCategoryTensors():
    each category gets a small set of answer indices whose entries are
    smoothing / len(idx), zeros elsewhere."""
    vecs = np.zeros((NUM_CAT, num_classes), dtype=np.float32)
    sizes = [4, 3, 2, 6, 5]  # answers per category (deterministic)
    for k in range(NUM_CAT):
        subkey = jax.random.fold_in(key, k)
        idx = np.asarray(jax.random.permutation(subkey, num_classes)[: sizes[k]])
        vecs[k, idx] = SMOOTHING / sizes[k]
    return jnp.asarray(vecs)


if __name__ == "__main__":
    key = jax.random.PRNGKey(0)
    k_x, k_t, k_c, k_v = jax.random.split(key, 4)

    # Case 1: f32 logits, C=32, single tile.
    NUM_CLASSES = 32
    category_vectors = _make_category_vectors(k_v, NUM_CLASSES)
    B = 8
    x = jax.random.normal(k_x, (B, NUM_CLASSES), dtype=jnp.float32)
    target = jax.random.randint(k_t, (B,), 0, NUM_CLASSES, dtype=jnp.int32)
    category = jax.random.randint(k_c, (B,), 0, NUM_CAT, dtype=jnp.int32)

    loss = jax.block_until_ready(
        label_smooth_by_category_loss(x, target, category, category_vectors))
    ref = jax.block_until_ready(
        _reference_loss(x, target, category, category_vectors))
    assert np.allclose(np.asarray(loss), np.asarray(ref), rtol=1e-5, atol=1e-5), (
        loss, ref)

    # Case 2: bf16 logits, batch (20) not a multiple of the forced tile (8):
    # exercises the multi-step batch grid with a partial last block and no
    # wrapper-side padding.
    B2 = 20
    x2 = jax.random.normal(jax.random.fold_in(k_x, 1),
                           (B2, NUM_CLASSES)).astype(jnp.bfloat16)
    target2 = jax.random.randint(jax.random.fold_in(k_t, 1), (B2,),
                                 0, NUM_CLASSES, dtype=jnp.int32)
    category2 = jax.random.randint(jax.random.fold_in(k_c, 1), (B2,),
                                   0, NUM_CAT, dtype=jnp.int32)

    loss2 = jax.block_until_ready(
        label_smooth_by_category_loss(x2, target2, category2, category_vectors,
                                      tile_b=8))
    ref2 = jax.block_until_ready(
        _reference_loss(x2, target2, category2, category_vectors))
    assert np.allclose(np.asarray(loss2), np.asarray(ref2),
                       rtol=1e-4, atol=1e-4), (loss2, ref2)

    # Case 3: f32 logits, lane-dense C=128, auto tile selection (2 grid steps,
    # partial last block with B=12).
    NUM_CLASSES3 = 128
    category_vectors3 = _make_category_vectors(jax.random.fold_in(k_v, 3),
                                               NUM_CLASSES3)
    B3 = 12
    x3 = jax.random.normal(jax.random.fold_in(k_x, 3),
                           (B3, NUM_CLASSES3), dtype=jnp.float32)
    target3 = jax.random.randint(jax.random.fold_in(k_t, 3), (B3,),
                                 0, NUM_CLASSES3, dtype=jnp.int32)
    category3 = jax.random.randint(jax.random.fold_in(k_c, 3), (B3,),
                                   0, NUM_CAT, dtype=jnp.int32)

    loss3 = jax.block_until_ready(
        label_smooth_by_category_loss(x3, target3, category3, category_vectors3))
    ref3 = jax.block_until_ready(
        _reference_loss(x3, target3, category3, category_vectors3))
    assert np.allclose(np.asarray(loss3), np.asarray(ref3),
                       rtol=1e-5, atol=1e-5), (loss3, ref3)

    # TODO(synk): eval-branch (plain hard-label CrossEntropyLoss) is not exercised
    # here; only the training-branch soft-target CE is implemented in the kernel.
    print("KERNEL_OK")
</pallas_src>

<mosaic_0001>
module attributes {stable_mosaic.version = 11 : i64} {
  func.func @_label_smooth_ce_kernel(%arg0: i32, %arg1: memref<8x32xf32, #tpu.memory_space<vmem>>, %arg2: memref<8x1xi32, #tpu.memory_space<vmem>>, %arg3: memref<8x1xi32, #tpu.memory_space<vmem>>, %arg4: memref<8x32xf32, #tpu.memory_space<vmem>>, %arg5: memref<8x1xf32, #tpu.memory_space<vmem>>) attributes {dimension_semantics = [#tpu.dimension_semantics<parallel>], iteration_bounds = array<i64: 1>, scalar_prefetch = 0 : i64, scratch_operands = 0 : i64, tpu.core_type = #tpu.core_type<tc>, window_params = [{transform_indices = @transform_0, window_bounds = array<i64: 8, 32>}, {transform_indices = @transform_1, window_bounds = array<i64: 8, 1>}, {transform_indices = @transform_2, window_bounds = array<i64: 8, 1>}, {pipeline_mode = #tpu.pipeline_mode<synchronous>, transform_indices = @transform_3, window_bounds = array<i64: 8, 32>}, {transform_indices = @transform_4, window_bounds = array<i64: 8, 1>}]} {
    %c0 = arith.constant 0 : index
    %c0_0 = arith.constant 0 : index
    %0 = vector.load %arg1[%c0, %c0_0] : memref<8x32xf32, #tpu.memory_space<vmem>>, vector<8x32xf32>
    %c0_1 = arith.constant 0 : index
    %c0_2 = arith.constant 0 : index
    %1 = vector.load %arg2[%c0_1, %c0_2] : memref<8x1xi32, #tpu.memory_space<vmem>>, vector<8x1xi32>
    %c0_3 = arith.constant 0 : index
    %c0_4 = arith.constant 0 : index
    %2 = vector.load %arg3[%c0_3, %c0_4] : memref<8x1xi32, #tpu.memory_space<vmem>>, vector<8x1xi32>
    %cst = arith.constant dense<0xFF800000> : vector<8xf32>
    %3 = vector.multi_reduction <maximumf>, %0, %cst [1] : vector<8x32xf32> to vector<8xf32>
    %4 = vector.shape_cast %3 : vector<8xf32> to vector<8x1xf32>
    %5 = vector.broadcast %4 : vector<8x1xf32> to vector<8x32xf32>
    %6 = arith.subf %0, %5 : vector<8x32xf32>
    %7 = math.exp %6 : vector<8x32xf32>
    %cst_5 = arith.constant dense<0.000000e+00> : vector<8xf32>
    %8 = vector.multi_reduction <add>, %7, %cst_5 [1] : vector<8x32xf32> to vector<8xf32>
    %9 = vector.shape_cast %8 : vector<8xf32> to vector<8x1xf32>
    %10 = math.log %9 : vector<8x1xf32>
    %11 = arith.addf %10, %4 : vector<8x1xf32>
    %12 = tpu.iota {dimensions = array<i32: 1>} : vector<8x8xi32>
    %13 = vector.broadcast %2 : vector<8x1xi32> to vector<8x8xi32>
    %14 = arith.cmpi eq, %13, %12 : vector<8x8xi32>
    %15 = arith.extui %14 : vector<8x8xi1> to vector<8x8xi32>
    %16 = arith.sitofp %15 : vector<8x8xi32> to vector<8x8xf32>
    %c0_6 = arith.constant 0 : index
    %c0_7 = arith.constant 0 : index
    %17 = vector.load %arg4[%c0_6, %c0_7] : memref<8x32xf32, #tpu.memory_space<vmem>>, vector<8x32xf32>
    %cst_8 = arith.constant dense<0.000000e+00> : vector<8x32xf32>
    %18 = tpu.matmul %16, %17, %cst_8 {dimension_numbers = #tpu.dot_dimension_numbers<[1], [0], [0], [1], [0, 0, 1, 1], [], []>, precision = #tpu.contract_precision<fp32>} : vector<8x8xf32>, vector<8x32xf32>, vector<8x32xf32> -> vector<8x32xf32>
    %19 = tpu.iota {dimensions = array<i32: 1>} : vector<8x32xi32>
    %20 = vector.broadcast %1 : vector<8x1xi32> to vector<8x32xi32>
    %21 = arith.cmpi eq, %19, %20 : vector<8x32xi32>
    %cst_9 = arith.constant 0.899999976 : f32
    %22 = vector.broadcast %cst_9 : f32 to vector<8x32xf32>
    %23 = arith.select %21, %22, %18 : vector<8x32xi1>, vector<8x32xf32>
    %24 = vector.broadcast %11 : vector<8x1xf32> to vector<8x32xf32>
    %25 = arith.subf %24, %0 : vector<8x32xf32>
    %26 = arith.mulf %23, %25 : vector<8x32xf32>
    %cst_10 = arith.constant dense<0.000000e+00> : vector<8xf32>
    %27 = vector.multi_reduction <add>, %26, %cst_10 [1] : vector<8x32xf32> to vector<8xf32>
    %28 = vector.shape_cast %27 : vector<8xf32> to vector<8x1xf32>
    %c0_11 = arith.constant 0 : index
    %c0_12 = arith.constant 0 : index
    %29 = vector.load %arg5[%c0_11, %c0_12] : memref<8x1xf32, #tpu.memory_space<vmem>>, vector<8x1xf32>
    tpu.vector_store %arg5[%c0_11, %c0_12], %28 {strides = array<i32>} : memref<8x1xf32, #tpu.memory_space<vmem>>, vector<8x1xf32>,
    return
  }
  func.func @transform_0(%arg0: i32) -> (i32, i32) {
    %c0_i32 = arith.constant 0 : i32
    %c0_i32_0 = arith.constant 0 : i32
    return %arg0, %c0_i32 : i32, i32
  }
  func.func @transform_1(%arg0: i32) -> (i32, i32) {
    %c0_i32 = arith.constant 0 : i32
    %c0_i32_0 = arith.constant 0 : i32
    return %arg0, %c0_i32 : i32, i32
  }
  func.func @transform_2(%arg0: i32) -> (i32, i32) {
    %c0_i32 = arith.constant 0 : i32
    %c0_i32_0 = arith.constant 0 : i32
    return %arg0, %c0_i32 : i32, i32
  }
  func.func @transform_3(%arg0: i32) -> (i32, i32) {
    %c0_i32 = arith.constant 0 : i32
    %c0_i32_0 = arith.constant 0 : i32
    %c0_i32_1 = arith.constant 0 : i32
    return %c0_i32, %c0_i32_0 : i32, i32
  }
  func.func @transform_4(%arg0: i32) -> (i32, i32) {
    %c0_i32 = arith.constant 0 : i32
    %c0_i32_0 = arith.constant 0 : i32
    return %arg0, %c0_i32 : i32, i32
  }
}

</mosaic_0001>

<bundles_post_ra>
// kernel: tpu_custom_call.1
= control target key start
LH: loop header
LB: loop body
LE: loop exit
PB: predicated region body
PF: predicated region fallthrough
CT: control target
= control target key end

     0   :  { %v563_v0 = vmov 0   ;;  %v564_v2 = vmov 0.0   ;;  %vm565_vm0 = vmmov 0   ;;  %vm20_vm1 = vcmask 261120   ;;  %s624_s2 = inlined_call_operand.vmem [shape: s32[8,1], index: 2, kind: input, shape index: {}]   ;;  %s625_s3 = inlined_call_operand.vmem [shape: f32[8,32], index: 3, kind: input, shape index: {}]   ;;  %s626_s0 = inlined_call_operand.vmem [shape: f32[8,32], index: 0, kind: input, shape index: {}]   ;;  %s627_s1 = inlined_call_operand.vmem [shape: s32[8,1], index: 1, kind: input, shape index: {}]   ;;  %s628_s4 = inlined_call_operand.vmem [shape: f32[8,1], index: 4, kind: output, shape index: {}]  }
   0x1   :  { %557 = vset.pattern.permute.xlu0 %v563_v0  ;;  %v19_v1 = vld [vmem:[%s624_s2] sm:$0xff]  ;;  %529 = vmatprep.subr.mxu1 %v564_v2  ;;  %v33_v11 = vlaneseq  ;;  %vm42_vm2 = vcmask 64512   ;;  %vm502_vm5 = vcmask 7168  }
   0x2   :  { %v41_v3 = vld [vmem:[%s625_s3] sm:$0xff]  ;;  %36 = vperm.xlu0 %557, %v19_v1   ;;  %531 = vmatprep.mubr.msk.f32.mxu1 %vm565_vm0, %v564_v2 }
   0x3   :  { %v77_v4 = vand.u32 4294901760, %v41_v3  ;;  %524 = vmatprep.subr.mxu0 %v564_v2  ;;  %526 = vmatprep.mubr.msk.f32.mxu0 %vm565_vm0, %v564_v2  ;;  %v602_v9 = vld [vmem:[%s626_s0] sm:$0xff]  ;;  %v34_v12 = vand.u32 127, %v33_v11 }
   0x4   :  { %558 = vset.pattern.permute.xlu1 %v563_v0  ;;  %v21_v10 = vsel %vm20_vm1, %v602_v9, -inf  ;;  %v18_v25 = vld [vmem:[%s627_s1] sm:$0xff] }
   0x5   :  { %v154_v5 = vsub.f32 %v41_v3, %v77_v4  ;;  %525 = vmatpush3.msra.mxu0 %v77_v4 }
   0x6   :  { %534 = vmatprep.subr.mxu0 %v564_v2 }
   0x7   :  { %v155_v6 = vand.u32 4294901760, %v154_v5 }
   0x9   :  { %v156_v7 = vsub.f32 %v154_v5, %v155_v6 }
   0xb   :  { %v157_v8 = vand.u32 4294901760, %v156_v7 }
   0xd   :  { %530 = vmatpush3.msra.mxu1 %v157_v8 }
   0xe   :  { %539 = vmatprep.subr.mxu1 %v564_v2 }
  0x21   :  { %22 = vmax.xlane.f32.xlu0 %v21_v10 }
  0x7d   :  { %v37_v13 = vpop.permute.xlu0 %36 }
  0x7e   :  { %vm38_vm3 = vcmp.eq.s32.totalorder %v37_v13, %v34_v12 }
  0x7f   :  { %v508_v14 = vsel %vm38_vm3, 1.0, %v564_v2 }
  0x80   :  { %v44_v15 = vsel %vm42_vm2, %v508_v14, 0  ;;  %532 = vmatmul.mubr.msk.f32.vlgmr.msra.gmra.mxu1 %vm42_vm2, %v508_v14 }
  0x81   :  { %v113_v16 = vsub.f32 %v44_v15, %v44_v15  ;;  %540 = vmatpush3.msra.mxu1 %v77_v4  ;;  %541 = vmatprep.mubr.msk.f32.mxu1 %vm565_vm0, %v564_v2 }
  0x82   :  { %549 = vmatprep.subr.mxu1 %v564_v2 }
  0x83   :  { %v114_v17 = vand.u32 4294901760, %v113_v16 }
  0x85   :  { %542 = vmatmul.mubr.f32.vlgmr.msra.gmra.mxu1 %v114_v17  ;;  %v115_v18 = vsub.f32 %v113_v16, %v114_v17 }
  0x86   :  { %550 = vmatpush3.msra.mxu1 %v77_v4  ;;  %551 = vmatprep.mubr.msk.f32.mxu1 %vm565_vm0, %v564_v2 }
  0x87   :  { %v116_v19 = vand.u32 4294901760, %v115_v18 }
  0x89   :  { %527 = vmatmul.mubr.f32.vlgmr.msra.gmra.mxu0 %v116_v19  ;;  %552 = vmatmul.mubr.msk.f32.vlgmr.msra.gmra.mxu1 %vm42_vm2, %v508_v14 }
  0x8a   :  { %535 = vmatpush3.msra.mxu0 %v154_v5  ;;  %536 = vmatprep.mubr.msk.f32.mxu0 %vm565_vm0, %v564_v2 }
  0x8b   :  { %544 = vmatprep.subr.mxu0 %v564_v2 }
  0x8d   :  { %537 = vmatmul.mubr.f32.vlgmr.msra.gmra.mxu0 %v113_v16 }
  0x8e   :  { %545 = vmatpush3.msra.mxu0 %v155_v6  ;;  %546 = vmatprep.mubr.msk.f32.mxu0 %vm565_vm0, %v564_v2 }
  0x91   :  { %547 = vmatmul.mubr.msk.f32.vlgmr.msra.gmra.mxu0 %vm42_vm2, %v508_v14 }
  0xaa   :  { %v23_v20 = vpop.xlane.xlu0 %22 }
  0xab   :  { %v24_v21 = vsub.f32 %v602_v9, %v23_v20 }
  0xad   :  { %v25_v22 = vmul.f32 1.442695, %v24_v21 }
  0xaf   :  { %559 = vpow2.f32 %v25_v22 }
  0xbc   :  { %v560_v23 = vpop.eup %559 }
  0xbd   :  { %v27_v24 = vsel %vm20_vm1, %v560_v23, 0.0 }
  0xbe   :  { %28 = vadd.xlane.f32.xlu1 %v27_v24 }
  0xcf   :  { %493 = vperm.xlu1 %558, %v18_v25  }
 0x140   :  { %v194_v26 = vpop.f32.mrf.mxu1 }
 0x142   :  { %v533_v27 = vpop.f32.mrf.mxu1 }
 0x145   :  { %v342_v28 = vpop.f32.mrf.mxu1 }
 0x147   :  { %v543_v29 = vpop.f32.mrf.mxu1  ;;  %v29_v30 = vpop.xlane.xlu1 %28 }
 0x148   :  { %561 = vlog2.f32 %v29_v30 }
 0x149   :  { %v118_v31 = vpop.f32.mrf.mxu0  ;;  %v488_v32 = vpop.f32.mrf.mxu1 }
 0x14a   :  { %v195_v35 = vadd.f32 %v194_v26, %v118_v31 }
 0x14b   :  { %v528_v33 = vpop.f32.mrf.mxu0  ;;  %v553_v34 = vpop.f32.mrf.mxu1 }
 0x14c   :  { %v494_v44 = vpop.permute.xlu1 %493 }
 0x14d   :  { %v268_v36 = vpop.f32.mrf.mxu0  ;;  %vm495_vm4 = vcmp.eq.s32.totalorder %v34_v12, %v494_v44 }
 0x14e   :  { %v269_v37 = vadd.f32 %v268_v36, %v195_v35 }
 0x14f   :  { %v538_v38 = vpop.f32.mrf.mxu0 }
 0x150   :  { %v343_v39 = vadd.f32 %v342_v28, %v269_v37 }
 0x151   :  { %v416_v40 = vpop.f32.mrf.mxu0 }
 0x152   :  { %v417_v41 = vadd.f32 %v416_v40, %v343_v39 }
 0x153   :  { %v548_v42 = vpop.f32.mrf.mxu0 }
 0x154   :  { %v489_v46 = vadd.f32 %v488_v32, %v417_v41 }
 0x155   :  { %v562_v43 = vpop.eup %561 }
 0x156   :  { %v31_v45 = vmul.f32 0.6931472, %v562_v43  ;;  %v496_v49 = vsel %vm495_vm4, 0.9, %v489_v46 }
 0x158   :  { %v32_v47 = vadd.f32 %v31_v45, %v23_v20 }
 0x15a   :  { %v497_v48 = vsub.f32 %v32_v47, %v602_v9 }
 0x15c   :  { %v498_v50 = vmul.f32 %v497_v48, %v496_v49 }
 0x15e   :  { %v499_v51 = vsel %vm20_vm1, %v498_v50, 0.0 }
 0x15f   :  { %500 = vadd.xlane.f32.xlu1 %v499_v51 }
 0x1e8   :  { %v501_v52 = vpop.xlane.xlu1 %500 }
 0x1e9   :  { %503 = vst.msk [vmem:[%s628_s4] sm:$0xff] %vm502_vm5, %v501_v52 }

</bundles_post_ra>
